<compile_context>
chip_gen: v7x
topology: tpu7x:2x2x1
jax: 0.10.0
libtpu: 0.0.40
codegen_flags: <defaults>
</compile_context>

<pallas_src>
import math
import functools

import jax
import jax.numpy as jnp
from jax import lax
from jax.experimental import pallas as pl
from jax.experimental.pallas import tpu as pltpu


def _build_pe_table(max_len: int, d_model: int, dtype=jnp.float32):
    """Replicates the buffer built in PositionalEncoding.__init__."""
    position = jnp.arange(max_len, dtype=jnp.float32)[:, None]            # (L, 1)
    div_term = jnp.exp(
        jnp.arange(0, d_model, 2, dtype=jnp.float32) * (-math.log(10000.0) / d_model)
    )                                                                      # (D/2,)
    angles = position * div_term                                           # (L, D/2)
    pe = jnp.zeros((max_len, d_model), dtype=jnp.float32)
    pe = pe.at[:, 0::2].set(jnp.sin(angles))
    pe = pe.at[:, 1::2].set(jnp.cos(angles))
    return pe[:, None, :].astype(dtype)                                    # (L, 1, D)


def _pe_add_kernel(x_ref, pe_ref, o_ref):
    # Pure fused elementwise add on lane-dense (ts, B*D) blocks.
    o_ref[...] = x_ref[...] + pe_ref[...]


def _lsr32(x, n):
    """Logical right shift for int32 (arithmetic shift + mask of sign bits)."""
    return (x >> n) & jnp.int32((1 << (32 - n)) - 1)


def _pe_dropout_kernel(seed_ref, x_ref, pe_ref, o_ref, *, tile_s, row_len, p):
    # Training path: inverted dropout, keep prob 1-p, scale 1/(1-p).
    y = x_ref[...] + pe_ref[...]

    # Counter-based PRNG: murmur3 fmix32 of the global flat element index.
    # Uses only int32 xor/mul/shift/and so it lowers on Mosaic AND interpret.
    shape = y.shape
    row0 = pl.program_id(0) * tile_s
    r = lax.broadcasted_iota(jnp.int32, shape, 0) + row0
    c = lax.broadcasted_iota(jnp.int32, shape, 1)
    h = r * jnp.int32(row_len) + c
    h = h ^ seed_ref[0]
    h = h ^ _lsr32(h, 16)
    h = h * jnp.int32(-2048144789)      # 0x85EBCA6B (two's-complement int32)
    h = h ^ _lsr32(h, 13)
    h = h * jnp.int32(-1028477387)      # 0xC2B2AE35
    h = h ^ _lsr32(h, 16)
    u24 = _lsr32(h, 8)                  # uniform over [0, 2^24)

    thresh = jnp.int32(min(int(round(p * (1 << 24))), (1 << 24) - 1))
    keep = u24 >= thresh                # P(keep) = 1 - p
    scale = jnp.asarray(1.0 / (1.0 - p), dtype=y.dtype)
    zero = jnp.zeros((), dtype=y.dtype)
    o_ref[...] = jnp.where(keep, y * scale, zero)


def _choose_seq_tile(S, row_bytes, itemsize):
    """~4 MiB x blocks, multiple of the sublane pack, and >= 2 grid steps when possible."""
    sub = max(8, 32 // itemsize)              # 8 for f32, 16 for bf16, 32 for int8
    s_pad = pl.cdiv(S, sub) * sub
    target_blk = 4 << 20
    ts = max(sub, (target_blk // row_bytes) // sub * sub)
    ts = min(ts, s_pad)
    if s_pad >= 2 * sub:                      # keep megacore / pipeline overlap alive
        ts = min(ts, max(sub, (s_pad // (2 * sub)) * sub))
    return ts


# Cache the pre-broadcast, lane-dense PE slab per (buffer, S, B, dtype) — this
# mirrors the torch registered buffer and keeps the per-call path trivial.
_PE_CACHE = {}


def _prepare_pe(pe_table, S, B, dtype):
    key = (id(pe_table), S, B, jnp.dtype(dtype).name)
    pe = _PE_CACHE.get(key)
    if pe is None:
        D = pe_table.shape[-1]
        pe = jnp.broadcast_to(pe_table[:S], (S, B, D)).reshape(S, B * D).astype(dtype)
        _PE_CACHE[key] = pe
    return pe


def positional_encoding(x, pe_table, *, p=0.1, training=False, seed=0):
    """x: (S, B, D).  Returns dropout(x + pe[:S]) with the module's semantics."""
    S, B, D = x.shape
    if S > pe_table.shape[0]:
        raise ValueError(f"sequence length {S} exceeds max_len {pe_table.shape[0]}")
    if training and p >= 1.0:
        return jnp.zeros_like(x)              # torch nn.Dropout(p=1) zeroes everything

    itemsize = jnp.dtype(x.dtype).itemsize
    BD = B * D
    row_bytes = BD * itemsize

    ts = _choose_seq_tile(S, row_bytes, itemsize)
    grid_len = pl.cdiv(S, ts)

    x2 = x.reshape(S, BD)                     # lane-dense, contiguous (free reshape)
    pe2 = _prepare_pe(pe_table, S, B, x.dtype)

    # VMEM budget: double-buffered x/pe/out blocks + in-kernel int32/select
    # temporaries (conservative ~16 B/elem) + margin; clamp fits v5e/v6e/v7x.
    blk_bytes = ts * row_bytes
    vmem_need = 6 * blk_bytes + ts * BD * 16 + (2 << 20)
    vmem_limit = int(min(max(vmem_need, 32 << 20), 48 << 20))

    cparams = pltpu.CompilerParams(
        dimension_semantics=("parallel",),    # no carried state; v7x megacore sharding
        vmem_limit_bytes=vmem_limit,
    )
    out_shape = jax.ShapeDtypeStruct((S, BD), x.dtype)

    if training and p > 0.0:
        kernel = functools.partial(_pe_dropout_kernel, tile_s=ts, row_len=BD, p=float(p))
        seed_arr = jnp.array([seed], dtype=jnp.int32)
        out = pl.pallas_call(
            kernel,
            out_shape=out_shape,
            grid_spec=pltpu.PrefetchScalarGridSpec(
                num_scalar_prefetch=1,
                grid=(grid_len,),
                in_specs=[
                    pl.BlockSpec((ts, BD), lambda i, sref: (i, 0)),
                    pl.BlockSpec((ts, BD), lambda i, sref: (i, 0)),
                ],
                out_specs=pl.BlockSpec((ts, BD), lambda i, sref: (i, 0)),
            ),
            compiler_params=cparams,
        )(seed_arr, x2, pe2)
    else:
        # Eval mode: dropout is identity; no seed operand needed.
        out = pl.pallas_call(
            _pe_add_kernel,
            out_shape=out_shape,
            grid_spec=pl.GridSpec(
                grid=(grid_len,),
                in_specs=[
                    pl.BlockSpec((ts, BD), lambda i: (i, 0)),
                    pl.BlockSpec((ts, BD), lambda i: (i, 0)),
                ],
                out_specs=pl.BlockSpec((ts, BD), lambda i: (i, 0)),
            ),
            compiler_params=cparams,
        )(x2, pe2)

    return out.reshape(S, B, D)


if __name__ == "__main__":
    # Small shapes consistent with the module's forward: (seq, batch, d_model).
    S, B, D = 16, 2, 128          # B*D = 256 -> lane-dense (multiple of 128)
    MAX_LEN = 64                  # module default is 5000; small synthetic table here

    key = jax.random.PRNGKey(0)
    x = jax.random.normal(key, (S, B, D), dtype=jnp.float32)
    pe_table = _build_pe_table(MAX_LEN, D, dtype=jnp.float32)

    # --- eval-mode forward (dropout = identity), matching module.eval() ---
    out = jax.block_until_ready(positional_encoding(x, pe_table, p=0.1, training=False))
    ref = x + pe_table[:S]
    assert out.shape == (S, B, D)
    assert jnp.allclose(out, ref, atol=1e-6, rtol=1e-6), "eval mismatch vs reference"

    # --- training-mode forward (in-kernel hash-PRNG dropout) ---
    # The mask is stochastic (not bit-identical to torch's RNG), but every
    # element must be either dropped (0) or equal to (x + pe) / (1 - p).
    # TODO(synk): torch's exact dropout RNG stream is not reproducible on TPU;
    # a deterministic counter-based hash PRNG is used instead.
    p = 0.1
    out_tr = jax.block_until_ready(
        positional_encoding(x, pe_table, p=p, training=True, seed=1234)
    )
    scaled = ref * jnp.float32(1.0 / (1.0 - p))
    dropped = jnp.abs(out_tr) < 1e-6
    kept_ok = jnp.abs(out_tr - scaled) < 1e-4
    assert bool(jnp.all(jnp.logical_or(dropped, kept_ok))), \
        "dropout output not in {0, (x+pe)/(1-p)}"
    frac = float(jnp.mean(dropped.astype(jnp.float32)))
    assert 0.01 < frac < 0.5, f"drop fraction {frac} inconsistent with p={p}"

    print("KERNEL_OK")
</pallas_src>

<mosaic_0001>
module attributes {stable_mosaic.version = 11 : i64} {
  func.func @_pe_add_kernel(%arg0: i32, %arg1: memref<8x256xf32, #tpu.memory_space<vmem>>, %arg2: memref<8x256xf32, #tpu.memory_space<vmem>>, %arg3: memref<8x256xf32, #tpu.memory_space<vmem>>) attributes {dimension_semantics = [#tpu.dimension_semantics<parallel>], iteration_bounds = array<i64: 2>, scalar_prefetch = 0 : i64, scratch_operands = 0 : i64, tpu.core_type = #tpu.core_type<tc>, window_params = [{transform_indices = @transform_0, window_bounds = array<i64: 8, 256>}, {transform_indices = @transform_1, window_bounds = array<i64: 8, 256>}, {transform_indices = @transform_2, window_bounds = array<i64: 8, 256>}]} {
    %c0 = arith.constant 0 : index
    %c0_0 = arith.constant 0 : index
    %0 = vector.load %arg1[%c0, %c0_0] : memref<8x256xf32, #tpu.memory_space<vmem>>, vector<8x256xf32>
    %c0_1 = arith.constant 0 : index
    %c0_2 = arith.constant 0 : index
    %1 = vector.load %arg2[%c0_1, %c0_2] : memref<8x256xf32, #tpu.memory_space<vmem>>, vector<8x256xf32>
    %2 = arith.addf %0, %1 : vector<8x256xf32>
    %c0_3 = arith.constant 0 : index
    %c0_4 = arith.constant 0 : index
    %3 = vector.load %arg3[%c0_3, %c0_4] : memref<8x256xf32, #tpu.memory_space<vmem>>, vector<8x256xf32>
    tpu.vector_store %arg3[%c0_3, %c0_4], %2 {strides = array<i32>} : memref<8x256xf32, #tpu.memory_space<vmem>>, vector<8x256xf32>,
    return
  }
  func.func @transform_0(%arg0: i32) -> (i32, i32) {
    %c0_i32 = arith.constant 0 : i32
    %c0_i32_0 = arith.constant 0 : i32
    return %arg0, %c0_i32 : i32, i32
  }
  func.func @transform_1(%arg0: i32) -> (i32, i32) {
    %c0_i32 = arith.constant 0 : i32
    %c0_i32_0 = arith.constant 0 : i32
    return %arg0, %c0_i32 : i32, i32
  }
  func.func @transform_2(%arg0: i32) -> (i32, i32) {
    %c0_i32 = arith.constant 0 : i32
    %c0_i32_0 = arith.constant 0 : i32
    return %arg0, %c0_i32 : i32, i32
  }
}

</mosaic_0001>

<bundles_post_ra>
// kernel: tpu_custom_call.1
= control target key start
LH: loop header
LB: loop body
LE: loop exit
PB: predicated region body
PF: predicated region fallthrough
CT: control target
= control target key end

     0   :  { %7 = vsyncpa [#allocation3], 0  ;;  %s745_s0 = inlined_call_operand.hbm [shape: f32[16,256], index: 0, kind: input, shape index: {}]   ;;  %s746_s1 = inlined_call_operand.hbm [shape: f32[16,256], index: 1, kind: input, shape index: {}]   ;;  %s747_s2 = inlined_call_operand.hbm [shape: f32[16,256], index: 2, kind: output, shape index: {}]  }
   0x1   :  { %9 = vsyncpa [#allocation3 + $0x1], 0 }
   0x2   :  { %10 = vsyncpa [#allocation6], 0 }
   0x3   :  { %12 = vsyncpa [#allocation6 + $0x1], 0 }
   0x4   :  { %13 = vsyncpa [#allocation4], 0 }
   0x5   :  { %15 = vsyncpa [#allocation4 + $0x1], 0  ;;  %s536_s9 = smov 0   ;;  %s538_s10 = smov 0  }
   0x6   :  { %s540_s11 = smov 0   ;;  %s542_s12 = smov 0  }
   0x7 LB: > { %s557_s13 = sadd.s32 4294967295, %s516_s12   ;;  %s314_s14 = sadd.s32 4294967294, %s516_s12   ;;  %s516_s12 = sphi %s542_s12, %s766_s12   ;;  %s512_s11 = sphi %s540_s11, %s765_s11   ;;  %s508_s10 = sphi %s538_s10, %s764_s10   ;;  %s504_s9 = sphi %s536_s9, %s763_s9  }
   0x8   : > { %s561_s15 = sadd.s32 1, %s516_s12   ;;  %s28_s16 = sadd.s32 1, %s512_s11 }
   0x9   : > { %s25_s17 = ssub.s32 %s516_s12, %s561_s15  ;;  %p35_p0 = scmp.ne.s32.totalorder %s512_s11, %s508_s10 }
   0xa   : > { %p26_p1 = scmp.eq.s32.totalorder %s25_s17, 0  ;;  %p36_p2 = scmp.eq.s32.totalorder %s516_s12, 0 }
   0xb   : > { %p41_p3 = scmp.ne.s32.totalorder %s508_s10, %s504_s9  ;;  %p42_p4 = scmp.eq.s32.totalorder %s557_s13, 0 }
   0xc   : > { %s573_s18 = scalar_select %p26_p1, %s512_s11, %s28_s16  }
   0xd   : > { %p575_p5 = por %p36_p2, %p35_p0  ;;  %p579_p6 = por %p42_p4, %p41_p3 }
   0xe   : > { %p91_p7 = scmp.eq.s32.totalorder %s557_s13, 1  ;;  %p97_p8 = scmp.eq.s32.totalorder %s314_s14, 1 }
   0xf   : > { %s751_s20 = scalar_select %p579_p6, 1, 0 }
  0x10   : > { %p352_p10 = scmp.lt.s32.totalorder %s516_s12, 2  ;;  %p586_p11 = por %p91_p7, %p35_p0 }
  0x11   : > { %p590_p12 = por %p97_p8, %p41_p3  ;;  %s595_s23 = sand.u32 1, %s512_s11  }
  0x12   : > { %s752_s21 = scalar_select %p586_p11, 1, 0 }
  0x13   : > { %s753_s22 = scalar_select %p590_p12, 1, 0 }
  0x14   : > { %s332_s24 = sshll.u32 %s516_s12, 8  ;;  %s317_s25 = sshll.u32 %s595_s23, 4 }
  0x15   : > { %s604_s28 = scalar_lea.hbm %s745_s0, %s332_s24  ;;  %s121_s29 = scalar_lea.vmem [#allocation2], %s317_s25 }
  0x16   : > { %s129_s30 = sshll.u32 %s121_s29, 4  ;;  %p610_p13 = pnand %p352_p10, %p575_p5  ;;  %s614_s30 = int_to_ptr.vmem [resolvable:$true] %s129_s30 }
  0x17   : > { %s118_s4 = scalar_lea.sflag [#allocation3], %s595_s23  ;;  %s386_s5 = scalar_lea.hbm %s604_s28, 256 }
  0x18   : > { %p387_p2 = scmp.ne.s32.totalorder %s604_s28, %s386_s5  ;;  %p388_p3 = pneg %p610_p13 }
  0x19   : > { %s391_s8 = scalar_lea.hbm %s745_s0, 512  ;;  %p392_p5 = scmp.lt.u32.totalorder %s604_s28, %s745_s0 }
  0x1a   : > { %p389_p4 = pnand %p388_p3, %p387_p2  ;;  %p393_p8 = scmp.lt.u32.totalorder %s391_s8, %s386_s5 }
  0x1b   : > { %p395_p9 = scmp.lt.u32.totalorder %s386_s5, %s604_s28 }
  0x1c   : > { %p390_p7 = pneg %p389_p4  ;;  %p394_p10 = por %p393_p8, %p392_p5 }
  0x1e   : > { %p396_p0 = por %p395_p9, %p394_p10 }
  0x20   : > { %p397_p1 = pnand %p396_p0, %p390_p7 }
  0x22   : > { %400 = shalt.err (!%p397_p1)
}
  0x23   : > { %s401_s17 = scalar_lea.vmem %s614_s30, 256  ;;  %s518_s19 = smov [#allocation2]  }
  0x24   : > { %p402_p2 = scmp.ne.s32.totalorder %s614_s30, %s401_s17  ;;  %s406_s26 = sshll.u32 %s518_s19, 4  ;;  %s407_s26 = int_to_ptr.vmem [resolvable:$false] %s406_s26 }
  0x25   : > { %s408_s27 = scalar_lea.vmem %s407_s26, 512  ;;  %p409_p11 = scmp.lt.s32.totalorder %s614_s30, %s407_s26 }
  0x26   : > { %p404_p4 = pnand %p402_p2, %p388_p3  ;;  %p410_p5 = scmp.lt.s32.totalorder %s408_s27, %s401_s17 }
  0x28   : > { %p405_p12 = pneg %p404_p4  ;;  %p411_p8 = por %p410_p5, %p409_p11 }
  0x2a   : > { %p412_p9 = pnand %p411_p8, %p405_p12 }
  0x2c   : > { %415 = shalt.err (!%p412_p9)
}
  0x2d   : > { %344 = dma.hbm_to_vmem [thread:$0]  (!%p610_p13), %s604_s28, 256, %s614_s30, %s118_s4  }
  0x2e   : > { %p755_p0 = scmp.lt.s32.totalorder %s516_s12, 3  ;;  %p756_p1 = scmp.ge.s32.totalorder %s516_s12, 1 }
  0x2f   : > { %s657_s7 = scalar_lea.hbm %s746_s1, %s332_s24  ;;  %s140_s8 = scalar_lea.vmem [#allocation5], %s317_s25 }
  0x30   : > { %p648_p7 = pnand %p756_p1, %p755_p0  ;;  %s148_s14 = sshll.u32 %s140_s8, 4  ;;  %s149_s14 = int_to_ptr.vmem [resolvable:$true] %s148_s14 }
  0x31   : > { %s137_s28 = scalar_lea.sflag [#allocation6], %s595_s23  ;;  %s416_s30 = scalar_lea.hbm %s657_s7, 256 }
  0x32   : > { %s757_s29 = scalar_select %p648_p7, 1, 0 }
  0x33   : > { %p417_p11 = scmp.ne.s32.totalorder %s657_s7, %s416_s30  ;;  %s421_s24 = scalar_lea.hbm %s746_s1, 512 }
  0x34   : > { %p422_p2 = scmp.lt.u32.totalorder %s657_s7, %s746_s1  ;;  %p423_p4 = scmp.lt.u32.totalorder %s421_s24, %s416_s30 }
  0x35   : > { %p419_p12 = pnand %p417_p11, %p388_p3  ;;  %p425_p8 = scmp.lt.u32.totalorder %s416_s30, %s657_s7 }
  0x36   : > { %p424_p5 = por %p423_p4, %p422_p2 }
  0x37   : > { %p420_p10 = pneg %p419_p12 }
  0x38   : > { %p426_p9 = por %p425_p8, %p424_p5 }
  0x3a   : > { %p427_p0 = pnand %p426_p9, %p420_p10 }
  0x3c   : > { %430 = shalt.err (!%p427_p0)
}
  0x3d   : > { %s431_s23 = scalar_lea.vmem %s149_s14, 256  ;;  %s519_s25 = smov [#allocation5]  }
  0x3e   : > { %p432_p1 = scmp.ne.s32.totalorder %s149_s14, %s431_s23  ;;  %s436_s26 = sshll.u32 %s519_s25, 4  ;;  %s437_s26 = int_to_ptr.vmem [resolvable:$false] %s436_s26 }
  0x3f   : > { %s438_s27 = scalar_lea.vmem %s437_s26, 512  ;;  %p439_p6 = scmp.lt.s32.totalorder %s149_s14, %s437_s26 }
  0x40   : > { %p434_p11 = pnand %p432_p1, %p388_p3  ;;  %p440_p7 = scmp.lt.s32.totalorder %s438_s27, %s431_s23 }
  0x42   : > { %p435_p12 = pneg %p434_p11  ;;  %p441_p2 = por %p440_p7, %p439_p6 }
  0x44   : > { %p442_p4 = pnand %p441_p2, %p435_p12 }
  0x46   : > { %445 = shalt.err (!%p442_p4)
}
  0x47   : > { %347 = dma.hbm_to_vmem [thread:$0]  (!%p610_p13), %s657_s7, 256, %s149_s14, %s137_s28  }
  0x48   : > { %p758_p10 = scmp.ne.s32.totalorder %s757_s29, 0 }
  0x49   : > { %s684_s5 = sand.u32 (!%p758_p10), 1, %s508_s10   ;;  %p759_p3 = scmp.ne.s32.totalorder (!%p758_p10), %s751_s20, 0 }
  0x4a   : > { %157 = sbr.rel (%p758_p10) target bundleno = 110 (0x6e), region = 28  ;;  %s324_s6 = sshll.u32 (!%p758_p10), %s684_s5, 4 }
  0x4b   : > { %s160_s8 = scalar_lea.sflag (!%p758_p10), [#allocation3], %s684_s5  ;;  %s163_s30 = scalar_lea.vmem (!%p758_p10), [#allocation2], %s324_s6 }
  0x51   : > { %491 = dma.done.wait (%p759_p3), %s160_s8, 256  }
  0x52   : > { %493 = vsyncadd (%p759_p3), %s160_s8, 4294967040  ;;  %s169_s3 = scalar_lea.sflag [#allocation6], %s684_s5  ;;  %s172_s7 = scalar_lea.vmem [#allocation5], %s324_s6 }
  0x53   : > { %495 = dma.done.wait (%p759_p3), %s169_s3, 256  }
  0x54   : > { %497 = vsyncadd (%p759_p3), %s169_s3, 4294967040  ;;  %s197_s29 = scalar_lea.vmem [#allocation7], %s324_s6  ;;  %s334_s28 = sshll.u32 %s557_s13, 8  ;;  %v198_v0 = vld [vmem:[%s163_s30] sm:$0xff]  ;;  %v199_v2 = vld [vmem:[%s163_s30 + $0x8] sm:$0xff] }
  0x55   : > { %s221_s14 = sshll.u32 %s197_s29, 4  ;;  %v200_v1 = vld [vmem:[%s172_s7] sm:$0xff]  ;;  %v201_v4 = vld [vmem:[%s172_s7 + $0x8] sm:$0xff]  ;;  %s703_s16 = scalar_lea.hbm %s747_s2, %s334_s28  ;;  %s698_s14 = int_to_ptr.vmem [resolvable:$true] %s221_s14 }
  0x56   : > { %v202_v3 = vadd.f32 %v200_v1, %v198_v0  ;;  %v203_v5 = vadd.f32 %v201_v4, %v199_v2  ;;  %s207_s24 = scalar_lea.sflag [#allocation4], %s684_s5  ;;  %s446_s13 = scalar_lea.vmem %s698_s14, 256 }
  0x57   : > { %p447_p6 = scmp.ne.s32.totalorder %s698_s14, %s446_s13  ;;  %p760_p13 = scmp.ne.s32.totalorder %s752_s21, 0 }
  0x58   : > { %204 = vst [vmem:[%s197_s29] sm:$0xff] %v202_v3  ;;  %205 = vst [vmem:[%s197_s29 + $0x8] sm:$0xff] %v203_v5  ;;  %s520_s17 = smov [#allocation7]  }
  0x59   : > { %p448_p7 = pnand %p447_p6, %p760_p13  ;;  %s450_s19 = sshll.u32 %s520_s17, 4  ;;  %s451_s19 = int_to_ptr.vmem [resolvable:$false] %s450_s19 }
  0x5a   : > { %s452_s23 = scalar_lea.vmem %s451_s19, 512  ;;  %p453_p8 = scmp.lt.s32.totalorder %s698_s14, %s451_s19 }
  0x5b   : > { %p449_p5 = pneg %p448_p7  ;;  %p454_p9 = scmp.lt.s32.totalorder %s452_s23, %s446_s13 }
  0x5d   : > { %p455_p0 = por %p454_p9, %p453_p8 }
  0x5f   : > { %p456_p1 = pnand %p455_p0, %p449_p5 }
  0x61   : > { %459 = shalt.err (!%p456_p1)
}
  0x62   : > { %s460_s25 = scalar_lea.hbm %s703_s16, 256  ;;  %s464_s5 = scalar_lea.hbm %s747_s2, 512 }
  0x63   : > { %p461_p11 = scmp.ne.s32.totalorder %s703_s16, %s460_s25  ;;  %p465_p4 = scmp.lt.u32.totalorder %s703_s16, %s747_s2 }
  0x64   : > { %p466_p10 = scmp.lt.u32.totalorder %s464_s5, %s460_s25  ;;  %p468_p6 = scmp.lt.u32.totalorder %s460_s25, %s703_s16 }
  0x65   : > { %p462_p12 = pnand %p461_p11, %p760_p13 }
  0x66   : > { %p467_p3 = por %p466_p10, %p465_p4 }
  0x67   : > { %p463_p2 = pneg %p462_p12 }
  0x68   : > { %p469_p7 = por %p468_p6, %p467_p3 }
  0x6a   : > { %p470_p5 = pnand %p469_p7, %p463_p2 }
  0x6c   : > { %473 = shalt.err (!%p470_p5)
}
  0x6d   : > { %339 = dma.vmem_to_hbm [thread:$0]  (%p760_p13), %s698_s14, 256, %s703_s16, %s207_s24  }
  0x6e PF: > { %s233_s30 = sand.u32 1, %s504_s9   ;;  %p761_p8 = scmp.ne.s32.totalorder %s753_s22, 0 }
  0x6f   : > { %p762_p9 = scmp.ge.s32.totalorder %s516_s12, 2  ;;  %s234_s3 = scalar_lea.sflag [#allocation4], %s233_s30 }
  0x71   : > { %p349_p0 = pnand %p762_p9, %p761_p8 }
  0x73   : > { %499 = dma.done.wait (!%p349_p0), %s234_s3, 256  }
  0x74   : > { %501 = vsyncadd (!%p349_p0), %s234_s3, 4294967040  ;;  %p18_p1 = scmp.ge.s32.totalorder %s561_s15, 4   ;;  %s763_s9 = smov %s508_s10 }
  0x75   : > { %s764_s10 = smov %s512_s11  ;;  %s765_s11 = smov %s573_s18 }
  0x76   : > { %s766_s12 = smov %s561_s15  ;;  %20 = sbr.rel (!%p18_p1) target bundleno = 7 (0x7), region = 86 }
  0x7d   :  { %239 = vsyncpa [#allocation3], 1 }
  0x7e   :  { %241 = vsyncpa [#allocation3 + $0x1], 1 }
  0x7f   :  { %242 = vsyncpa [#allocation6], 1 }
  0x80   :  { %244 = vsyncpa [#allocation6 + $0x1], 1 }
  0x81   :  { %245 = vsyncpa [#allocation4], 1 }
  0x82   :  { %247 = vsyncpa [#allocation4 + $0x1], 1 }

</bundles_post_ra>
